<compile_context>
chip_gen: v6e
topology: v6e:2x2x1
jax: 0.10.0
libtpu: 0.0.40
codegen_flags: <defaults>
</compile_context>

<pallas_src>
import jax
import jax.numpy as jnp
from jax.experimental import pallas as pl
from jax.experimental.pallas import tpu as pltpu

N_STYLES = 512
N_HIDDEN = 128
BN_EPS = 1e-5

_VMEM = pl.BlockSpec(memory_space=pltpu.MemorySpace.VMEM)


def _vmem_budget():
    """Generation-dependent VMEM cap: ~3/4 of physical (v7x: 48 MiB, v5e/v6e: 96 MiB)."""
    cap = 128 * 1024 * 1024
    try:
        cap = int(getattr(pltpu.get_tpu_info(), "vmem_capacity_bytes", cap))
    except Exception:
        pass
    return min(cap * 3 // 4, 100 * 1024 * 1024)


_VMEM_LIMIT = _vmem_budget()


def _cp(dims):
    return pltpu.CompilerParams(dimension_semantics=dims,
                                vmem_limit_bytes=_VMEM_LIMIT)


def _pick_row_tile(H, per_row_bytes):
    """Largest divisor of H that keeps the per-step working set well under the VMEM
    budget while still exposing >=2 row tiles (v7x megacore work even at batch 1)."""
    target = max(8, _VMEM_LIMIT // (3 * max(int(per_row_bytes), 1)))
    target = min(target, max(H // 2, 8), 512)
    t = max(1, min(H, target))
    while H % t:
        t -= 1
    return t


def _load_halo_window(src_hbm, n, row0, r, r_last, n_rows, W, TH, buf, sem, fill):
    """DMA rows [row0-1, row0+TH] of src_hbm[n] into buf; the body lands at
    buf[1:TH+1, 2:W+2, :] (even column offset keeps bf16 packing DMA-aligned).
    Rows/cols outside the image are set to `fill`.  buf: (TH+2, W+4, C) VMEM.
    TODO(synk): double-buffer this window DMA across grid steps to hide latency."""
    def _copy(src, dst):
        cp = pltpu.make_async_copy(src, dst, sem)
        cp.start()
        cp.wait()

    # body rows (always TH rows, fully inside the image)
    _copy(src_hbm.at[n, pl.ds(row0, TH)], buf.at[pl.ds(1, TH), pl.ds(2, W)])

    # top halo row
    @pl.when(r > 0)
    def _():
        _copy(src_hbm.at[n, pl.ds(jnp.maximum(row0 - 1, 0), 1)],
              buf.at[pl.ds(0, 1), pl.ds(2, W)])

    @pl.when(r == 0)
    def _():
        buf[0:1, :, :] = jnp.full((1,) + buf.shape[1:], fill, buf.dtype)

    # bottom halo row
    @pl.when(r < r_last)
    def _():
        _copy(src_hbm.at[n, pl.ds(jnp.minimum(row0 + TH, n_rows - 1), 1)],
              buf.at[pl.ds(TH + 1, 1), pl.ds(2, W)])

    @pl.when(r == r_last)
    def _():
        buf[TH + 1:TH + 2, :, :] = jnp.full((1,) + buf.shape[1:], fill, buf.dtype)

    # left/right halo columns: filled every step (scratch persists across steps and
    # "parallel" grids may be split across cores, so never rely on step 0 having run).
    buf[:, 0:2, :] = jnp.full((buf.shape[0], 2, buf.shape[2]), fill, buf.dtype)
    buf[:, W + 2:W + 4, :] = jnp.full((buf.shape[0], 2, buf.shape[2]), fill, buf.dtype)


# ----------------------------------------------------------------------------
# Pallas kernels
# ----------------------------------------------------------------------------
def conv3x3(x, w_oihw, b, *, in_act=None, out_act=None, residual=None,
            out_dtype=jnp.bfloat16):
    """3x3 conv, stride 1, pad 1, NHWC, bf16 MXU matmuls with f32 accumulation.

    Gridded over (batch, H-row tiles); the halo window is DMA'd from HBM into a
    VMEM scratch (no padded HBM copy, border-only fill).  Small-Cin convs use a
    single im2col (TH*W, 9*Cin) matmul to raise MXU K-occupancy.  Optional fused
    input leaky-relu / output relu / residual add."""
    N, H, W, Cin = x.shape
    Cout = w_oihw.shape[0]
    x = x.astype(jnp.bfloat16)
    im2col = Cin <= 128
    wk = jnp.transpose(w_oihw, (2, 3, 1, 0)).astype(jnp.bfloat16)     # (3,3,Cin,Cout)
    wk = wk.reshape(9 * Cin, Cout) if im2col else wk.reshape(9, Cin, Cout)
    bk = (jnp.zeros((Cout,), jnp.float32) if b is None else b.astype(jnp.float32))
    bk = bk.reshape(1, Cout)
    has_res = residual is not None

    per_row = (W + 4) * Cin * 2 * (10 if im2col else 3) + W * Cout * 12
    TH = _pick_row_tile(H, per_row)
    R = H // TH
    w_zero = (0,) * wk.ndim

    def kernel(*refs):
        if has_res:
            x_hbm, w_ref, b_ref, res_ref, o_ref, xbuf, sem = refs
        else:
            x_hbm, w_ref, b_ref, o_ref, xbuf, sem = refs
        n, r = pl.program_id(0), pl.program_id(1)
        row0 = r * TH
        _load_halo_window(x_hbm, n, row0, r, pl.num_programs(1) - 1, H, W, TH,
                          xbuf, sem, 0)
        if in_act == "leaky_relu":                       # F.leaky_relu(x, 0.2) fused
            xv = xbuf[...]
            xbuf[...] = jnp.where(xv >= 0, xv,
                                  (xv.astype(jnp.float32) * 0.2).astype(xv.dtype))
        if im2col:
            # one (TH*W, 9*Cin) patch matrix -> single high-K MXU matmul
            patches = jnp.concatenate(
                [xbuf[dy:dy + TH, dx + 1:dx + 1 + W, :]
                 for dy in range(3) for dx in range(3)], axis=-1)
            acc = jnp.dot(patches.reshape(TH * W, 9 * Cin), w_ref[...],
                          preferred_element_type=jnp.float32)
        else:
            acc = jnp.zeros((TH * W, Cout), jnp.float32)
            for t in range(9):                           # 9 shifted K=Cin matmuls
                dy, dx = t // 3, t % 3
                patch = xbuf[dy:dy + TH, dx + 1:dx + 1 + W, :].reshape(TH * W, Cin)
                acc = acc + jnp.dot(patch, w_ref[t],
                                    preferred_element_type=jnp.float32)
        out = acc + b_ref[...]
        if out_act == "relu":
            out = jnp.maximum(out, 0.0)
        out = out.reshape(1, TH, W, Cout)
        if has_res:
            out = out + res_ref[...].astype(jnp.float32)
        o_ref[...] = out.astype(o_ref.dtype)

    in_specs = [pl.BlockSpec(memory_space=pl.ANY),
                pl.BlockSpec(wk.shape, lambda n, r: w_zero),
                pl.BlockSpec((1, Cout), lambda n, r: (0, 0))]
    args = [x, wk, bk]
    if has_res:
        in_specs.append(pl.BlockSpec((1, TH, W, Cout), lambda n, r: (n, r, 0, 0)))
        args.append(residual)

    return pl.pallas_call(
        kernel,
        out_shape=jax.ShapeDtypeStruct((N, H, W, Cout), out_dtype),
        grid_spec=pltpu.PrefetchScalarGridSpec(
            num_scalar_prefetch=0,
            grid=(N, R),
            in_specs=in_specs,
            out_specs=pl.BlockSpec((1, TH, W, Cout), lambda n, r: (n, r, 0, 0)),
            scratch_shapes=[pltpu.VMEM((TH + 2, W + 4, Cin), jnp.bfloat16),
                            pltpu.SemaphoreType.DMA]),
        compiler_params=_cp(("parallel", "parallel")),
    )(*args)


def conv1x1_nobias(x, w_oihw, *, out_dtype=jnp.float32):
    """1x1 conv without bias (spectral-norm shortcut), row-tiled, bf16 matmul."""
    N, H, W, Cin = x.shape
    Cout = w_oihw.shape[0]
    wk = jnp.transpose(w_oihw.reshape(Cout, Cin), (1, 0)).astype(jnp.bfloat16)
    TH = _pick_row_tile(H, W * (Cin * 4 + Cout * 8))
    R = H // TH

    def kernel(x_ref, w_ref, o_ref):
        xv = x_ref[...].reshape(TH * W, Cin).astype(jnp.bfloat16)
        o_ref[...] = jnp.dot(xv, w_ref[...], preferred_element_type=jnp.float32
                             ).reshape(1, TH, W, Cout).astype(o_ref.dtype)

    return pl.pallas_call(
        kernel,
        out_shape=jax.ShapeDtypeStruct((N, H, W, Cout), out_dtype),
        grid_spec=pltpu.PrefetchScalarGridSpec(
            num_scalar_prefetch=0, grid=(N, R),
            in_specs=[pl.BlockSpec((1, TH, W, Cin), lambda n, r: (n, r, 0, 0)),
                      pl.BlockSpec((Cin, Cout), lambda n, r: (0, 0))],
            out_specs=pl.BlockSpec((1, TH, W, Cout), lambda n, r: (n, r, 0, 0))),
        compiler_params=_cp(("parallel", "parallel")),
    )(x, wk)


def bn_stats(x, *, eps=BN_EPS):
    """Parameter-free (Sync)BatchNorm2d training-mode statistics over (N,H,W).

    One pass: shifted sum / sum-of-squares accumulated across an (N, H//TH) grid
    (accumulator init/finalize via pl.when).  Normalization itself is fused into
    the downstream blend kernels so x_norm never hits HBM."""
    N, H, W, C = x.shape
    TH = _pick_row_tile(H, W * C * 8)
    R = H // TH
    inv_n = 1.0 / float(N * H * W)

    def kernel(x_ref, mean_ref, rstd_ref, shift_ref, s_ref, ss_ref):
        n, r = pl.program_id(0), pl.program_id(1)
        first = jnp.logical_and(n == 0, r == 0)
        last = jnp.logical_and(n == pl.num_programs(0) - 1,
                               r == pl.num_programs(1) - 1)
        xv = x_ref[...].reshape(TH * W, C).astype(jnp.float32)

        @pl.when(first)
        def _():
            shift_ref[...] = xv[0:1, :]            # per-channel shift for stability
            s_ref[...] = jnp.zeros_like(s_ref)
            ss_ref[...] = jnp.zeros_like(ss_ref)

        d = xv - shift_ref[...]
        s_ref[...] += jnp.sum(d, axis=0, keepdims=True)
        ss_ref[...] += jnp.sum(d * d, axis=0, keepdims=True)

        @pl.when(last)
        def _():
            m = s_ref[...] * inv_n
            var = jnp.maximum(ss_ref[...] * inv_n - m * m, 0.0)   # biased variance
            mean_ref[...] = shift_ref[...] + m
            rstd_ref[...] = jax.lax.rsqrt(var + eps)

    return pl.pallas_call(
        kernel,
        out_shape=(jax.ShapeDtypeStruct((1, C), jnp.float32),
                   jax.ShapeDtypeStruct((1, C), jnp.float32)),
        grid_spec=pltpu.PrefetchScalarGridSpec(
            num_scalar_prefetch=0, grid=(N, R),
            in_specs=[pl.BlockSpec((1, TH, W, C), lambda n, r: (n, r, 0, 0))],
            out_specs=(pl.BlockSpec((1, C), lambda n, r: (0, 0)),
                       pl.BlockSpec((1, C), lambda n, r: (0, 0))),
            scratch_shapes=[pltpu.VMEM((1, C), jnp.float32)] * 3),
        compiler_params=_cp(("arbitrary", "arbitrary")),
    )(x)


def style_mu(style_codes, w_t, b):
    """Per-style Linear(512,512)+ReLU, hoisted out of the fused blend kernel.
    style_codes (N,L,K) f32, w_t (L,K,K) bf16 [in,out], b (L,K) f32 -> (N,L,K) bf16."""
    N, L, K = style_codes.shape

    def kernel(c_ref, w_ref, b_ref, o_ref):
        cv = c_ref[...].astype(jnp.bfloat16)
        bv = b_ref[...]
        outs = []
        for l in range(L):
            m = jnp.dot(cv[:, l, :], w_ref[l], preferred_element_type=jnp.float32)
            outs.append(jnp.maximum(m + bv[l:l + 1, :], 0.0))        # F.relu
        o_ref[...] = jnp.stack(outs, axis=1).astype(o_ref.dtype)

    return pl.pallas_call(
        kernel,
        out_shape=jax.ShapeDtypeStruct((N, L, K), jnp.bfloat16),
        in_specs=[_VMEM, _VMEM, _VMEM],
        out_specs=_VMEM,
        compiler_params=pltpu.CompilerParams(vmem_limit_bytes=_VMEM_LIMIT),
    )(style_codes, w_t, b)


def ace_style_blend(x, winner, hid, mean, rstd, mu, w_style, w_spade, bias,
                    *, out_dtype=jnp.bfloat16):
    """Fused ACE style path + SPADE gamma/beta conv + BN-normalize + blend.

    Per (batch, row-tile) grid step:
      middle = one_hot(winner) @ mu                          (masked_scatter_ build)
      gb     = conv3x3(middle; a*W_style) + conv3x3(hid; (1-a)*W_spade) + bias
      out    = (x - mean) * rstd * (1 + gb[:, :C]) + gb[:, C:]
    `middle`, spade/style gamma-beta and x_norm never touch HBM; the blend sigmoid
    scalars are folded into the weights/bias by the wrapper."""
    N, H, W, C = x.shape
    K = w_style.shape[1]            # N_STYLES
    Ch = w_spade.shape[1]           # N_HIDDEN
    L = mu.shape[1]
    C2 = w_style.shape[2]           # 2*C
    hid = hid.astype(jnp.bfloat16)

    per_row = (W + 4) * (K * 6 + Ch * 2 + 8) + W * (C2 * 8 + C * 16)
    TH = _pick_row_tile(H, per_row)
    R = H // TH

    def kernel(x_ref, mean_ref, rstd_ref, mu_ref, ws_ref, wh_ref, b_ref,
               win_hbm, hid_hbm, o_ref, wbuf, hbuf, mbuf, sem):
        n, r = pl.program_id(0), pl.program_id(1)
        row0 = r * TH
        last = pl.num_programs(1) - 1

        # halo windows: winner labels (border / "no label" = -1) and SPADE hidden
        _load_halo_window(win_hbm, n, row0, r, last, H, W, TH, wbuf, sem, -1)
        _load_halo_window(hid_hbm, n, row0, r, last, H, W, TH, hbuf, sem, 0)

        # masked_scatter_: middle[p] = mu[winner[p]], 0 where no label fired
        muv = mu_ref[...].reshape(L, K)                                   # bf16
        li = jax.lax.broadcasted_iota(jnp.int32, (TH + 2, W + 4, L), 2)
        onehot = (li == wbuf[...]).astype(jnp.bfloat16)                   # -1 -> zeros
        mid = jnp.dot(onehot.reshape((TH + 2) * (W + 4), L), muv,
                      preferred_element_type=jnp.float32)
        mbuf[...] = mid.reshape(TH + 2, W + 4, K).astype(jnp.bfloat16)

        # conv_gamma|conv_beta(middle) + mlp_gamma|mlp_beta(hid) -> one accumulator
        acc = jnp.zeros((TH * W, C2), jnp.float32) + b_ref[...]
        for t in range(9):
            dy, dx = t // 3, t % 3
            pm = mbuf[dy:dy + TH, dx + 1:dx + 1 + W, :].reshape(TH * W, K)
            acc = acc + jnp.dot(pm, ws_ref[t], preferred_element_type=jnp.float32)
            ph = hbuf[dy:dy + TH, dx + 1:dx + 1 + W, :].reshape(TH * W, Ch)
            acc = acc + jnp.dot(ph, wh_ref[t], preferred_element_type=jnp.float32)

        # BN-normalize + ACE blend epilogue (f32 VPU)
        xv = x_ref[...].reshape(TH * W, C).astype(jnp.float32)
        xn = (xv - mean_ref[...]) * rstd_ref[...]
        out = xn * (1.0 + acc[:, :C]) + acc[:, C:]
        o_ref[...] = out.reshape(1, TH, W, C).astype(o_ref.dtype)

    return pl.pallas_call(
        kernel,
        out_shape=jax.ShapeDtypeStruct((N, H, W, C), out_dtype),
        grid_spec=pltpu.PrefetchScalarGridSpec(
            num_scalar_prefetch=0,
            grid=(N, R),
            in_specs=[
                pl.BlockSpec((1, TH, W, C), lambda n, r: (n, r, 0, 0)),   # x
                pl.BlockSpec((1, C), lambda n, r: (0, 0)),                # mean
                pl.BlockSpec((1, C), lambda n, r: (0, 0)),                # rstd
                pl.BlockSpec((1, L, K), lambda n, r: (n, 0, 0)),          # mu
                # TODO(synk): single-buffer these constant weight blocks (pl.Buffered(1)).
                pl.BlockSpec((9, K, C2), lambda n, r: (0, 0, 0)),         # style conv W
                pl.BlockSpec((9, Ch, C2), lambda n, r: (0, 0, 0)),        # spade conv W
                pl.BlockSpec((1, C2), lambda n, r: (0, 0)),               # fused bias
                pl.BlockSpec(memory_space=pl.ANY),                        # winner labels
                pl.BlockSpec(memory_space=pl.ANY),                        # hid
            ],
            out_specs=pl.BlockSpec((1, TH, W, C), lambda n, r: (n, r, 0, 0)),
            scratch_shapes=[pltpu.VMEM((TH + 2, W + 4, 1), jnp.int32),
                            pltpu.VMEM((TH + 2, W + 4, Ch), jnp.bfloat16),
                            pltpu.VMEM((TH + 2, W + 4, K), jnp.bfloat16),
                            pltpu.SemaphoreType.DMA]),
        compiler_params=_cp(("parallel", "parallel")),
    )(x, mean, rstd, mu, w_style, w_spade, bias, winner, hid)


def ace_nostyle_blend(x, mean, rstd, spade_gb, *, out_dtype=jnp.bfloat16):
    """apply_style=False path: out = x_norm * (1 + spade_gamma) + spade_beta."""
    N, H, W, C = x.shape
    TH = _pick_row_tile(H, W * C * 20)
    R = H // TH

    def kernel(x_ref, mean_ref, rstd_ref, gb_ref, o_ref):
        xv = x_ref[...].reshape(TH * W, C).astype(jnp.float32)
        xn = (xv - mean_ref[...]) * rstd_ref[...]
        gb = gb_ref[...].reshape(TH * W, 2 * C).astype(jnp.float32)
        o_ref[...] = (xn * (1.0 + gb[:, :C]) + gb[:, C:]
                      ).reshape(1, TH, W, C).astype(o_ref.dtype)

    return pl.pallas_call(
        kernel,
        out_shape=jax.ShapeDtypeStruct((N, H, W, C), out_dtype),
        grid_spec=pltpu.PrefetchScalarGridSpec(
            num_scalar_prefetch=0, grid=(N, R),
            in_specs=[pl.BlockSpec((1, TH, W, C), lambda n, r: (n, r, 0, 0)),
                      pl.BlockSpec((1, C), lambda n, r: (0, 0)),
                      pl.BlockSpec((1, C), lambda n, r: (0, 0)),
                      pl.BlockSpec((1, TH, W, 2 * C), lambda n, r: (n, r, 0, 0))],
            out_specs=pl.BlockSpec((1, TH, W, C), lambda n, r: (n, r, 0, 0))),
        compiler_params=_cp(("parallel", "parallel")),
    )(x, mean, rstd, spade_gb)


# ----------------------------------------------------------------------------
# Module forward (glue orchestrating the kernels)
# ----------------------------------------------------------------------------
def nearest_resize_nchw(seg, H, W):
    """F.interpolate(seg, size=(H,W), mode='nearest') — src = floor(dst * in/out)."""
    b, c, h_in, w_in = seg.shape
    if (h_in, w_in) == (H, W):
        return seg
    rows = (jnp.arange(H) * h_in) // H
    cols = (jnp.arange(W) * w_in) // W
    return seg[:, :, rows[:, None], cols[None, :]]


def ace_forward(p, x_nhwc, seg_nhwc, winner, style_codes, apply_style=True):
    N, H, W, C = x_nhwc.shape
    # generate_noise(): noise_var is initialized to zeros (ACE.__init__), so the
    # randn * noise_var term is identically zero and x + noise == x.
    # TODO(synk): a trained non-zero noise_var would need a torch-RNG-matching randn.
    mean, rstd = bn_stats(x_nhwc)

    # SPADE shared conv + ReLU (fused epilogue) -> hid, bf16 intermediate
    hid = conv3x3(seg_nhwc, p["spade_shared_w"], p["spade_shared_b"],
                  out_act="relu", out_dtype=jnp.bfloat16)

    if not apply_style:
        w_gb = jnp.concatenate([p["spade_gamma_w"], p["spade_beta_w"]], axis=0)
        b_gb = jnp.concatenate([p["spade_gamma_b"], p["spade_beta_b"]], axis=0)
        spade_gb = conv3x3(hid, w_gb, b_gb, out_dtype=jnp.bfloat16)
        return ace_nostyle_blend(x_nhwc, mean, rstd, spade_gb, out_dtype=jnp.bfloat16)

    a_g = jax.nn.sigmoid(p["blending_gamma"])      # params are zeros -> 0.5
    a_b = jax.nn.sigmoid(p["blending_beta"])

    # per-style Linear+ReLU hoisted out of the fused blend kernel
    mu = style_mu(style_codes,
                  jnp.transpose(p["style_w"], (0, 2, 1)).astype(jnp.bfloat16),
                  p["style_b"].astype(jnp.float32))

    # style conv_gamma|conv_beta and SPADE mlp_gamma|mlp_beta; blend scalars folded
    ws = jnp.concatenate([p["conv_gamma_w"] * a_g, p["conv_beta_w"] * a_b], axis=0)
    ws = jnp.transpose(ws, (2, 3, 1, 0)).reshape(9, N_STYLES, 2 * C).astype(jnp.bfloat16)
    wh = jnp.concatenate([p["spade_gamma_w"] * (1.0 - a_g),
                          p["spade_beta_w"] * (1.0 - a_b)], axis=0)
    wh = jnp.transpose(wh, (2, 3, 1, 0)).reshape(9, N_HIDDEN, 2 * C).astype(jnp.bfloat16)
    bias = jnp.concatenate([p["conv_gamma_b"] * a_g + p["spade_gamma_b"] * (1.0 - a_g),
                            p["conv_beta_b"] * a_b + p["spade_beta_b"] * (1.0 - a_b)],
                           axis=0).reshape(1, 2 * C).astype(jnp.float32)

    return ace_style_blend(x_nhwc, winner, hid, mean, rstd, mu, ws, wh, bias,
                           out_dtype=jnp.bfloat16)


def spade_resnet_block_forward(params, x_nchw, seg_nchw, style_codes, apply_style=True):
    # Layout: PyTorch-style NCHW at the interface; NHWC inside the kernels.
    x = jnp.transpose(x_nchw, (0, 2, 3, 1)).astype(jnp.float32)
    N, H, W, _ = x.shape

    # resize seg once (shared by all three ACEs; spatial size is constant here)
    seg = nearest_resize_nchw(seg_nchw, H, W)                       # (N, L, H, W)
    seg_nhwc = jnp.transpose(seg, (0, 2, 3, 1)).astype(jnp.bfloat16)
    L = seg_nhwc.shape[-1]
    # per-pixel winning label ("last nonzero label wins" masked_scatter_; -1 = none)
    lab = jnp.arange(L, dtype=jnp.int32).reshape(1, 1, 1, L)
    winner = jnp.max(jnp.where(seg_nhwc != 0, lab, -1),
                     axis=-1, keepdims=True).astype(jnp.int32)      # (N, H, W, 1)

    if params["learned_shortcut"]:
        xs = ace_forward(params["ace_s"], x, seg_nhwc, winner, style_codes, apply_style)
        xs = conv1x1_nobias(xs, params["conv_s_w"], out_dtype=jnp.float32)
    else:
        xs = x

    dx = ace_forward(params["ace_0"], x, seg_nhwc, winner, style_codes, apply_style)
    dx = conv3x3(dx, params["conv_0_w"], params["conv_0_b"],
                 in_act="leaky_relu", out_dtype=jnp.bfloat16)
    dx = ace_forward(params["ace_1"], dx, seg_nhwc, winner, style_codes, apply_style)
    out = conv3x3(dx, params["conv_1_w"], params["conv_1_b"],
                  in_act="leaky_relu", residual=xs, out_dtype=jnp.float32)  # xs + dx
    return jnp.transpose(out, (0, 3, 1, 2))


# ----------------------------------------------------------------------------
# Deterministic parameter initialization (synthetic; shapes from __init__)
# ----------------------------------------------------------------------------
def spectral_normalize(w, key, n_power_iterations=1, eps=1e-12):
    """torch spectral_norm forward: one power iteration from a random u, W / sigma."""
    cout = w.shape[0]
    w_mat = w.reshape(cout, -1)
    u = jax.random.normal(key, (cout,), jnp.float32)
    u = u / (jnp.linalg.norm(u) + eps)
    v = None
    for _ in range(n_power_iterations):
        v = w_mat.T @ u
        v = v / (jnp.linalg.norm(v) + eps)
        u = w_mat @ v
        u = u / (jnp.linalg.norm(u) + eps)
    sigma = u @ (w_mat @ v)
    return w / sigma


def init_conv(key, cout, cin, k, scale=0.05):
    kw, kb = jax.random.split(key)
    w = jax.random.normal(kw, (cout, cin, k, k), jnp.float32) * scale
    b = jax.random.normal(kb, (cout,), jnp.float32) * scale
    return w, b


def init_ace(key, fin, label_nc):
    ks = jax.random.split(key, 7)
    p = {}
    p["blending_gamma"] = jnp.zeros((), jnp.float32)       # torch init: zeros
    p["blending_beta"] = jnp.zeros((), jnp.float32)        # torch init: zeros
    p["noise_var"] = jnp.zeros((fin,), jnp.float32)        # torch init: zeros -> noise == 0
    p["spade_shared_w"], p["spade_shared_b"] = init_conv(ks[0], N_HIDDEN, label_nc, 3)
    p["spade_gamma_w"], p["spade_gamma_b"] = init_conv(ks[1], fin, N_HIDDEN, 3)
    p["spade_beta_w"], p["spade_beta_b"] = init_conv(ks[2], fin, N_HIDDEN, 3)
    p["style_w"] = jax.random.normal(ks[3], (label_nc, N_STYLES, N_STYLES), jnp.float32) * 0.02
    p["style_b"] = jax.random.normal(ks[4], (label_nc, N_STYLES), jnp.float32) * 0.02
    p["conv_gamma_w"], p["conv_gamma_b"] = init_conv(ks[5], fin, N_STYLES, 3, scale=0.02)
    p["conv_beta_w"], p["conv_beta_b"] = init_conv(ks[6], fin, N_STYLES, 3, scale=0.02)
    return p


def init_block(key, fin, fout, label_nc):
    fmiddle = min(fin, fout)
    ks = jax.random.split(key, 9)
    p = {"learned_shortcut": fin != fout}
    w0, b0 = init_conv(ks[0], fmiddle, fin, 3, scale=0.1)
    p["conv_0_w"] = spectral_normalize(w0, ks[1])
    p["conv_0_b"] = b0
    w1, b1 = init_conv(ks[2], fout, fmiddle, 3, scale=0.1)
    p["conv_1_w"] = spectral_normalize(w1, ks[3])
    p["conv_1_b"] = b1
    if p["learned_shortcut"]:
        ws = jax.random.normal(ks[4], (fout, fin, 1, 1), jnp.float32) * 0.1
        p["conv_s_w"] = spectral_normalize(ws, ks[5])      # bias=False in torch
        p["ace_s"] = init_ace(ks[6], fin, label_nc)
    p["ace_0"] = init_ace(ks[7], fin, label_nc)
    p["ace_1"] = init_ace(ks[8], fmiddle, label_nc)
    return p


# ----------------------------------------------------------------------------
if __name__ == "__main__":
    B, FIN, FOUT, LABEL_NC, H, W = 2, 4, 8, 3, 16, 16    # fin != fout -> learned_shortcut

    key = jax.random.PRNGKey(0)
    k_params, k_x, k_seg, k_style = jax.random.split(key, 4)

    params = init_block(k_params, FIN, FOUT, LABEL_NC)

    x = jax.random.normal(k_x, (B, FIN, H, W), jnp.float32)                   # NCHW like torch
    seg_labels = jax.random.randint(k_seg, (B, H // 2, W // 2), 0, LABEL_NC)  # half-res seg map
    seg = jnp.transpose(jax.nn.one_hot(seg_labels, LABEL_NC, dtype=jnp.float32),
                        (0, 3, 1, 2))                                         # (B, label_nc, 8, 8)
    style_codes = jax.random.normal(k_style, (B, LABEL_NC, N_STYLES), jnp.float32)

    out = spade_resnet_block_forward(params, x, seg, style_codes)
    out = jax.block_until_ready(out)
    assert out.shape == (B, FOUT, H, W), out.shape
    assert bool(jnp.all(jnp.isfinite(out)))

    # also exercise the apply_style=False (SPADE-only) path
    out_ns = spade_resnet_block_forward(params, x, seg, style_codes, apply_style=False)
    out_ns = jax.block_until_ready(out_ns)
    assert out_ns.shape == (B, FOUT, H, W), out_ns.shape
    assert bool(jnp.all(jnp.isfinite(out_ns)))

    print("KERNEL_OK")
</pallas_src>

<mosaic_0001>
module attributes {stable_mosaic.version = 11 : i64} {
  func.func @kernel(%arg0: i32, %arg1: i32, %arg2: memref<1x8x16x4xf32, #tpu.memory_space<vmem>>, %arg3: memref<1x4xf32, #tpu.memory_space<vmem>>, %arg4: memref<1x4xf32, #tpu.memory_space<vmem>>, %arg5: memref<1x4xf32, #tpu.memory_space<vmem>>, %arg6: memref<1x4xf32, #tpu.memory_space<vmem>>, %arg7: memref<1x4xf32, #tpu.memory_space<vmem>>) attributes {dimension_semantics = [#tpu.dimension_semantics<arbitrary>, #tpu.dimension_semantics<arbitrary>], iteration_bounds = array<i64: 2, 2>, scalar_prefetch = 0 : i64, scratch_operands = 3 : i64, tpu.core_type = #tpu.core_type<tc>, window_params = [{transform_indices = @transform_0, window_bounds = array<i64: 1, 8, 16, 4>}, {pipeline_mode = #tpu.pipeline_mode<synchronous>, transform_indices = @transform_1, window_bounds = array<i64: 1, 4>}, {pipeline_mode = #tpu.pipeline_mode<synchronous>, transform_indices = @transform_2, window_bounds = array<i64: 1, 4>}]} {
    %c0_i32 = arith.constant 0 : i32
    %0 = arith.cmpi eq, %arg0, %c0_i32 : i32
    %c0_i32_0 = arith.constant 0 : i32
    %1 = arith.cmpi eq, %arg1, %c0_i32_0 : i32
    %2 = arith.andi %0, %1 : i1
    %c1_i32 = arith.constant 1 : i32
    %3 = arith.cmpi eq, %arg0, %c1_i32 : i32
    %c1_i32_1 = arith.constant 1 : i32
    %4 = arith.cmpi eq, %arg1, %c1_i32_1 : i32
    %5 = arith.andi %3, %4 : i1
    %c0 = arith.constant 0 : index
    %c0_2 = arith.constant 0 : index
    %c0_3 = arith.constant 0 : index
    %c0_4 = arith.constant 0 : index
    %6 = vector.load %arg2[%c0, %c0_2, %c0_3, %c0_4] : memref<1x8x16x4xf32, #tpu.memory_space<vmem>>, vector<1x8x16x4xf32>
    %7 = vector.shape_cast %6 : vector<1x8x16x4xf32> to vector<128x4xf32>
    %8 = arith.extui %2 : i1 to i32
    %c0_i32_5 = arith.constant 0 : i32
    %9 = arith.cmpi ne, %8, %c0_i32_5 : i32
    scf.if %9 {
      %26 = vector.extract_strided_slice %7 {offsets = [0, 0], sizes = [1, 4], strides = [1, 1]} : vector<128x4xf32> to vector<1x4xf32>
      %c0_18 = arith.constant 0 : index
      %c0_19 = arith.constant 0 : index
      %27 = vector.load %arg5[%c0_18, %c0_19] : memref<1x4xf32, #tpu.memory_space<vmem>>, vector<1x4xf32>
      tpu.vector_store %arg5[%c0_18, %c0_19], %26 {strides = array<i32>} : memref<1x4xf32, #tpu.memory_space<vmem>>, vector<1x4xf32>,
      %cst_20 = arith.constant 0.000000e+00 : f32
      %28 = vector.broadcast %cst_20 : f32 to vector<1x4xf32>
      %c0_21 = arith.constant 0 : index
      %c0_22 = arith.constant 0 : index
      %29 = vector.load %arg6[%c0_21, %c0_22] : memref<1x4xf32, #tpu.memory_space<vmem>>, vector<1x4xf32>
      tpu.vector_store %arg6[%c0_21, %c0_22], %28 {strides = array<i32>} : memref<1x4xf32, #tpu.memory_space<vmem>>, vector<1x4xf32>,
      %cst_23 = arith.constant 0.000000e+00 : f32
      %30 = vector.broadcast %cst_23 : f32 to vector<1x4xf32>
      %c0_24 = arith.constant 0 : index
      %c0_25 = arith.constant 0 : index
      %31 = vector.load %arg7[%c0_24, %c0_25] : memref<1x4xf32, #tpu.memory_space<vmem>>, vector<1x4xf32>
      tpu.vector_store %arg7[%c0_24, %c0_25], %30 {strides = array<i32>} : memref<1x4xf32, #tpu.memory_space<vmem>>, vector<1x4xf32>,
    } else {
    }
    %c0_6 = arith.constant 0 : index
    %c0_7 = arith.constant 0 : index
    %10 = vector.load %arg5[%c0_6, %c0_7] : memref<1x4xf32, #tpu.memory_space<vmem>>, vector<1x4xf32>
    %11 = vector.broadcast %10 : vector<1x4xf32> to vector<128x4xf32>
    %12 = arith.subf %7, %11 : vector<128x4xf32>
    %c0_8 = arith.constant 0 : index
    %c0_9 = arith.constant 0 : index
    %13 = vector.load %arg6[%c0_8, %c0_9] : memref<1x4xf32, #tpu.memory_space<vmem>>, vector<1x4xf32>
    %cst = arith.constant dense<0.000000e+00> : vector<4xf32>
    %14 = vector.multi_reduction <add>, %12, %cst [0] : vector<128x4xf32> to vector<4xf32>
    %15 = vector.shape_cast %14 : vector<4xf32> to vector<1x4xf32>
    %16 = arith.addf %13, %15 : vector<1x4xf32>
    %c0_10 = arith.constant 0 : index
    %c0_11 = arith.constant 0 : index
    %17 = vector.load %arg6[%c0_10, %c0_11] : memref<1x4xf32, #tpu.memory_space<vmem>>, vector<1x4xf32>
    tpu.vector_store %arg6[%c0_10, %c0_11], %16 {strides = array<i32>} : memref<1x4xf32, #tpu.memory_space<vmem>>, vector<1x4xf32>,
    %c0_12 = arith.constant 0 : index
    %c0_13 = arith.constant 0 : index
    %18 = vector.load %arg7[%c0_12, %c0_13] : memref<1x4xf32, #tpu.memory_space<vmem>>, vector<1x4xf32>
    %19 = arith.mulf %12, %12 : vector<128x4xf32>
    %cst_14 = arith.constant dense<0.000000e+00> : vector<4xf32>
    %20 = vector.multi_reduction <add>, %19, %cst_14 [0] : vector<128x4xf32> to vector<4xf32>
    %21 = vector.shape_cast %20 : vector<4xf32> to vector<1x4xf32>
    %22 = arith.addf %18, %21 : vector<1x4xf32>
    %c0_15 = arith.constant 0 : index
    %c0_16 = arith.constant 0 : index
    %23 = vector.load %arg7[%c0_15, %c0_16] : memref<1x4xf32, #tpu.memory_space<vmem>>, vector<1x4xf32>
    tpu.vector_store %arg7[%c0_15, %c0_16], %22 {strides = array<i32>} : memref<1x4xf32, #tpu.memory_space<vmem>>, vector<1x4xf32>,
    %24 = arith.extui %5 : i1 to i32
    %c0_i32_17 = arith.constant 0 : i32
    %25 = arith.cmpi ne, %24, %c0_i32_17 : i32
    scf.if %25 {
      %c0_18 = arith.constant 0 : index
      %c0_19 = arith.constant 0 : index
      %26 = vector.load %arg6[%c0_18, %c0_19] : memref<1x4xf32, #tpu.memory_space<vmem>>, vector<1x4xf32>
      %cst_20 = arith.constant 0.001953125 : f32
      %27 = vector.broadcast %cst_20 : f32 to vector<1x4xf32>
      %28 = arith.mulf %26, %27 : vector<1x4xf32>
      %c0_21 = arith.constant 0 : index
      %c0_22 = arith.constant 0 : index
      %29 = vector.load %arg7[%c0_21, %c0_22] : memref<1x4xf32, #tpu.memory_space<vmem>>, vector<1x4xf32>
      %cst_23 = arith.constant 0.001953125 : f32
      %30 = vector.broadcast %cst_23 : f32 to vector<1x4xf32>
      %31 = arith.mulf %29, %30 : vector<1x4xf32>
      %32 = arith.mulf %28, %28 : vector<1x4xf32>
      %33 = arith.subf %31, %32 : vector<1x4xf32>
      %cst_24 = arith.constant 0.000000e+00 : f32
      %34 = vector.broadcast %cst_24 : f32 to vector<1x4xf32>
      %35 = arith.maximumf %33, %34 : vector<1x4xf32>
      %c0_25 = arith.constant 0 : index
      %c0_26 = arith.constant 0 : index
      %36 = vector.load %arg5[%c0_25, %c0_26] : memref<1x4xf32, #tpu.memory_space<vmem>>, vector<1x4xf32>
      %37 = arith.addf %36, %28 : vector<1x4xf32>
      %c0_27 = arith.constant 0 : index
      %c0_28 = arith.constant 0 : index
      %38 = vector.load %arg3[%c0_27, %c0_28] : memref<1x4xf32, #tpu.memory_space<vmem>>, vector<1x4xf32>
      tpu.vector_store %arg3[%c0_27, %c0_28], %37 {strides = array<i32>} : memref<1x4xf32, #tpu.memory_space<vmem>>, vector<1x4xf32>,
      %cst_29 = arith.constant 9.99999974E-6 : f32
      %39 = vector.broadcast %cst_29 : f32 to vector<1x4xf32>
      %40 = arith.addf %35, %39 : vector<1x4xf32>
      %41 = math.rsqrt %40 : vector<1x4xf32>
      %c0_30 = arith.constant 0 : index
      %c0_31 = arith.constant 0 : index
      %42 = vector.load %arg4[%c0_30, %c0_31] : memref<1x4xf32, #tpu.memory_space<vmem>>, vector<1x4xf32>
      tpu.vector_store %arg4[%c0_30, %c0_31], %41 {strides = array<i32>} : memref<1x4xf32, #tpu.memory_space<vmem>>, vector<1x4xf32>,
    } else {
    }
    return
  }
  func.func @transform_0(%arg0: i32, %arg1: i32) -> (i32, i32, i32, i32) {
    %c0_i32 = arith.constant 0 : i32
    %c0_i32_0 = arith.constant 0 : i32
    %c0_i32_1 = arith.constant 0 : i32
    return %arg0, %arg1, %c0_i32, %c0_i32_0 : i32, i32, i32, i32
  }
  func.func @transform_1(%arg0: i32, %arg1: i32) -> (i32, i32) {
    %c0_i32 = arith.constant 0 : i32
    %c0_i32_0 = arith.constant 0 : i32
    %c0_i32_1 = arith.constant 0 : i32
    return %c0_i32, %c0_i32_0 : i32, i32
  }
  func.func @transform_2(%arg0: i32, %arg1: i32) -> (i32, i32) {
    %c0_i32 = arith.constant 0 : i32
    %c0_i32_0 = arith.constant 0 : i32
    %c0_i32_1 = arith.constant 0 : i32
    return %c0_i32, %c0_i32_0 : i32, i32
  }
}

</mosaic_0001>

<bundles_post_ra>
// kernel: tpu_custom_call.1
= control target key start
LH: loop header
LB: loop body
LE: loop exit
PB: predicated region body
PF: predicated region fallthrough
CT: control target
= control target key end

     0   :  { %8 = vsyncpa [#allocation6], 0  ;;  %s767_s0 = inlined_call_operand.vmem [shape: f32[2,16,16,4], index: 0, kind: input, shape index: {}]   ;;  %s768_s1 = inlined_call_operand.hbm [shape: f32[1,4], index: 1, kind: output, shape index: {0}]   ;;  %s769_s2 = inlined_call_operand.hbm [shape: f32[1,4], index: 2, kind: output, shape index: {1}]  }
   0x1   :  { %9 = vsyncpa [#allocation8], 0  ;;  %s601_s9 = smov 0   ;;  %s603_s10 = smov 0  }
   0x2   :  { %s605_s11 = smov 0   ;;  %s607_s12 = smov 0  }
   0x3   :  { %s609_s13 = smov 0  }
   0x4 LB: > { %s415_s14 = sadd.s32 4294967295, %s581_s13   ;;  %s24_s15 = sadd.s32 1, %s573_s11  ;;  %s581_s13 = sphi %s609_s13, %s15_s13   ;;  %s577_s12 = sphi %s607_s12, %s776_s12   ;;  %s573_s11 = sphi %s605_s11, %s775_s11   ;;  %s569_s10 = sphi %s603_s10, %s774_s10   ;;  %s565_s9 = sphi %s601_s9, %s773_s9  }
   0x5   : > { %p25_p0 = scmp.ge.s32.totalorder %s24_s15, 2  ;;  %s27_s16 = sadd.s32 1, %s577_s12 }
   0x6   : > { %p418_p1 = scmp.ge.s32.totalorder %s581_s13, 1  ;;  %p127_p2 = scmp.lt.s32.totalorder %s581_s13, 5 }
   0x7   : > { %s778_s15 = smov (%p25_p0, %s24_s15), 0  ;;  %s780_s16 = smov (!%p25_p0, %s27_s16), %s577_s12 }
   0x8   : > { %p128_p3 = pnand %p418_p1, %p127_p2  ;;  %p29_p4 = scmp.ge.s32.totalorder %s780_s16, 2 }
   0x9   : > { %s419_s17 = sshll.u32 (!%p128_p3), %s565_s9, 3  ;;  %p150_p5 = scmp.lt.s32.totalorder (!%p128_p3), %s569_s10, 1 }
   0xa   : > { %s782_s16 = smov (%p29_p4, %s780_s16), 0  ;;  %131 = sbr.rel (%p128_p3) target bundleno = 145 (0x91), region = 24 }
   0xb   : > { %p152_p6 = scmp.lt.s32.totalorder (!%p128_p3), %s419_s17, 15  ;;  %p160_p7 = scmp.eq.s32.totalorder (!%p128_p3), %s569_s10, 0 }
   0xc   : > { %p161_p8 = scmp.eq.s32.totalorder (!%p128_p3), %s565_s9, 0  ;;  %p164_p9 = scmp.eq.s32.totalorder (!%p128_p3), %s569_s10, 1 }
   0xd   : > { %p165_p11 = scmp.eq.s32.totalorder (!%p128_p3), %s565_s9, 1 }
   0xe   : > { %p642_p10 = pnand (!%p128_p3), %p161_p8, %p160_p7 }
   0xf   : > { %s151_s18 = scalar_select %p150_p5, %s569_s10, 1 }
  0x10   : > { %s784_s17 = smov (!%p152_p6, %s419_s17), 15  ;;  %p650_p12 = pnand %p165_p11, %p164_p9 }
  0x11   : > { %s421_s19 = sshll.u32 %s151_s18, 5  ;;  %s420_s20 = sshll.u32 %s784_s17, 1 }
  0x12   : > { %s156_s21 = sadd.s32 %s421_s19, %s420_s20 }
  0x13   : > { %s422_s23 = sshll.u32 %s156_s21, 3 }
  0x14   : > { %s158_s26 = scalar_lea.vmem %s767_s0, %s422_s23 }
  0x15   : > { %v168_v0 = vld [vmem:[%s158_s26] sm:$0xff]  ;;  %v169_v1 = vld [vmem:[%s158_s26 + $0x8] sm:$0xff]  ;;  %v170_v2 = vld [vmem:[%s158_s26 + $0x10] sm:$0xff] }
  0x16   : > { %v171_v3 = vld [vmem:[%s158_s26 + $0x18] sm:$0xff]  ;;  %v172_v4 = vld [vmem:[%s158_s26 + $0x20] sm:$0xff]  ;;  %v173_v5 = vld [vmem:[%s158_s26 + $0x28] sm:$0xff]  ;;  %185 = sbr.rel (%p642_p10) target bundleno = 30 (0x1e), region = 28 }
  0x17   : > { %v174_v6 = vld [vmem:[%s158_s26 + $0x30] sm:$0xff]  ;;  %v175_v7 = vld [vmem:[%s158_s26 + $0x38] sm:$0xff]  ;;  %v176_v8 = vld [vmem:[%s158_s26 + $0x40] sm:$0xff] }
  0x18   : > { %v177_v9 = vld [vmem:[%s158_s26 + $0x48] sm:$0xff]  ;;  %v178_v10 = vld [vmem:[%s158_s26 + $0x50] sm:$0xff]  ;;  %v179_v11 = vld [vmem:[%s158_s26 + $0x58] sm:$0xff] }
  0x19   : > { %v654_v12 = vld [vmem:[%s158_s26 + $0x60] sm:$0xff]  ;;  %v656_v13 = vld [vmem:[%s158_s26 + $0x68] sm:$0xff]  ;;  %v658_v14 = vld [vmem:[%s158_s26 + $0x70] sm:$0xff] }
  0x1a   : > { %v660_v15 = vld [vmem:[%s158_s26 + $0x78] sm:$0xff] }
  0x1b   : > { %vm186_vm0 = vcmask 24576   ;;  %v583_v16 = vmov 0.0  }
  0x1c   : > { %187 = vst.msk [vmem:[#allocation2] sm:$0x1] %vm186_vm0, %v168_v0  ;;  %188 = vst.msk [vmem:[#allocation3] sm:$0x1] %vm186_vm0, %v583_v16 }
  0x1d   : > { %189 = vst.msk [vmem:[#allocation4] sm:$0x1] %vm186_vm0, %v583_v16 }
  0x1e PF: > { %vm214_vm1 = vcmask 31744   ;;  %vm253_vm2 = vcmask 24576  }
  0x23   : > { %v664_v17 = vld [vmem:[#allocation2] ss:$0 sm:$0xff] }
  0x24   : > { %v197_v18 = vsub.f32 %v168_v0, %v664_v17  ;;  %v198_v19 = vsub.f32 %v169_v1, %v664_v17  ;;  %v199_v20 = vsub.f32 %v170_v2, %v664_v17  ;;  %v200_v21 = vsub.f32 %v171_v3, %v664_v17 }
  0x25   : > { %v201_v26 = vsub.f32 %v172_v4, %v664_v17  ;;  %v202_v29 = vsub.f32 %v173_v5, %v664_v17  ;;  %v203_v35 = vsub.f32 %v174_v6, %v664_v17  ;;  %v204_v39 = vsub.f32 %v175_v7, %v664_v17 }
  0x26   : > { %v215_v22 = vsel %vm214_vm1, %v197_v18, 0.0  ;;  %v216_v23 = vsel %vm214_vm1, %v198_v19, 0.0  ;;  %v218_v24 = vsel %vm214_vm1, %v199_v20, 0.0  ;;  %v220_v27 = vsel %vm214_vm1, %v200_v21, 0.0 }
  0x27   : > { %v217_v25 = vadd.f32 %v216_v23, %v215_v22  ;;  %v222_v30 = vsel %vm214_vm1, %v201_v26, 0.0  ;;  %v256_v32 = vmul.f32 %v197_v18, %v197_v18  ;;  %v257_v33 = vmul.f32 %v198_v19, %v198_v19 }
  0x28   : > { %v258_v34 = vmul.f32 %v199_v20, %v199_v20  ;;  %v224_v36 = vsel %vm214_vm1, %v202_v29, 0.0  ;;  %v259_v38 = vmul.f32 %v200_v21, %v200_v21  ;;  %v226_v40 = vsel %vm214_vm1, %v203_v35, 0.0 }
  0x29   : > { %v219_v28 = vadd.f32 %v218_v24, %v217_v25  ;;  %v260_v41 = vmul.f32 %v201_v26, %v201_v26  ;;  %v272_v43 = vsel %vm214_vm1, %v256_v32, 0.0  ;;  %v273_v44 = vsel %vm214_vm1, %v257_v33, 0.0 }
  0x2a   : > { %v275_v45 = vsel %vm214_vm1, %v258_v34, 0.0  ;;  %v205_v46 = vsub.f32 %v176_v8, %v664_v17  ;;  %v228_v47 = vsel %vm214_vm1, %v204_v39, 0.0  ;;  %v274_v48 = vadd.f32 %v273_v44, %v272_v43 }
  0x2b   : > { %v221_v31 = vadd.f32 %v220_v27, %v219_v28  ;;  %v261_v50 = vmul.f32 %v202_v29, %v202_v29  ;;  %v277_v51 = vsel %vm214_vm1, %v259_v38, 0.0  ;;  %v206_v52 = vsub.f32 %v177_v9, %v664_v17 }
  0x2c   : > { %v230_v53 = vsel %vm214_vm1, %v205_v46, 0.0  ;;  %v276_v54 = vadd.f32 %v275_v45, %v274_v48  ;;  %v262_v56 = vmul.f32 %v203_v35, %v203_v35  ;;  %v279_v57 = vsel %vm214_vm1, %v260_v41, 0.0 }
  0x2d   : > { %v223_v37 = vadd.f32 %v222_v30, %v221_v31  ;;  %v207_v58 = vsub.f32 %v178_v10, %v664_v17  ;;  %v232_v59 = vsel %vm214_vm1, %v206_v52, 0.0  ;;  %v263_v62 = vmul.f32 %v204_v39, %v204_v39 }
  0x2e   : > { %v278_v60 = vadd.f32 %v277_v51, %v276_v54  ;;  %v281_v63 = vsel %vm214_vm1, %v261_v50, 0.0  ;;  %v208_v0 = vsub.f32 %v179_v11, %v664_v17  ;;  %v264_v4 = vmul.f32 %v205_v46, %v205_v46 }
  0x2f   : > { %v225_v42 = vadd.f32 %v224_v36, %v223_v37  ;;  %v234_v1 = vsel %vm214_vm1, %v207_v58, 0.0  ;;  %v283_v5 = vsel %vm214_vm1, %v262_v56, 0.0  ;;  %v209_v6 = vsub.f32 %v654_v12, %v664_v17 }
  0x30   : > { %v280_v2 = vadd.f32 %v279_v57, %v278_v60  ;;  %v236_v7 = vsel %vm214_vm1, %v208_v0, 0.0  ;;  %v265_v10 = vmul.f32 %v206_v52, %v206_v52  ;;  %v285_v16 = vsel %vm214_vm1, %v263_v62, 0.0 }
  0x31   : > { %v227_v49 = vadd.f32 %v226_v40, %v225_v42  ;;  %v210_v11 = vsub.f32 %v656_v13, %v664_v17  ;;  %v238_v18 = vsel %vm214_vm1, %v209_v6, 0.0  ;;  %v266_v21 = vmul.f32 %v207_v58, %v207_v58 }
  0x32   : > { %v282_v8 = vadd.f32 %v281_v63, %v280_v2  ;;  %v287_v22 = vsel %vm214_vm1, %v264_v4, 0.0  ;;  %v211_v12 = vsub.f32 %v658_v14, %v664_v17  ;;  %v267_v26 = vmul.f32 %v208_v0, %v208_v0 }
  0x33   : > { %v229_v55 = vadd.f32 %v228_v47, %v227_v49  ;;  %v240_v23 = vsel %vm214_vm1, %v210_v11, 0.0  ;;  %v289_v27 = vsel %vm214_vm1, %v265_v10, 0.0  ;;  %v212_v13 = vsub.f32 %v660_v15, %v664_v17 }
  0x34   : > { %v284_v19 = vadd.f32 %v283_v5, %v282_v8  ;;  %v242_v28 = vsel %vm214_vm1, %v211_v12, 0.0  ;;  %v268_v31 = vmul.f32 %v209_v6, %v209_v6  ;;  %v291_v32 = vsel %vm214_vm1, %v266_v21, 0.0 }
  0x35   : > { %v231_v61 = vadd.f32 %v230_v53, %v229_v55  ;;  %v244_v33 = vsel %vm214_vm1, %v212_v13, 0.0  ;;  %v269_v35 = vmul.f32 %v210_v11, %v210_v11  ;;  %v293_v36 = vsel %vm214_vm1, %v267_v26, 0.0  ;;  %v213_v53 = vld [vmem:[#allocation3] sm:$0x1] }
  0x36   : > { %v286_v24 = vadd.f32 %v285_v16, %v284_v19  ;;  %v270_v39 = vmul.f32 %v211_v12, %v211_v12  ;;  %v295_v40 = vsel %vm214_vm1, %v268_v31, 0.0  ;;  %v271_v41 = vmul.f32 %v212_v13, %v212_v13 }
  0x37   : > { %v233_v3 = vadd.f32 %v232_v59, %v231_v61  ;;  %v297_v42 = vsel %vm214_vm1, %v269_v35, 0.0  ;;  %v255_v61 = vld [vmem:[#allocation4] sm:$0x1] }
  0x38   : > { %v288_v29 = vadd.f32 %v287_v22, %v286_v24  ;;  %v299_v45 = vsel %vm214_vm1, %v270_v39, 0.0  ;;  %v301_v48 = vsel %vm214_vm1, %v271_v41, 0.0 }
  0x39   : > { %v235_v9 = vadd.f32 %v234_v1, %v233_v3 }
  0x3a   : > { %v290_v14 = vadd.f32 %v289_v27, %v288_v29 }
  0x3b   : > { %v237_v20 = vadd.f32 %v236_v7, %v235_v9 }
  0x3c   : > { %v292_v37 = vadd.f32 %v291_v32, %v290_v14 }
  0x3d   : > { %v239_v25 = vadd.f32 %v238_v18, %v237_v20 }
  0x3e   : > { %v294_v15 = vadd.f32 %v293_v36, %v292_v37 }
  0x3f   : > { %v241_v30 = vadd.f32 %v240_v23, %v239_v25 }
  0x40   : > { %v296_v43 = vadd.f32 %v295_v40, %v294_v15 }
  0x41   : > { %v243_v34 = vadd.f32 %v242_v28, %v241_v30 }
  0x42   : > { %v298_v46 = vadd.f32 %v297_v42, %v296_v43 }
  0x43   : > { %v245_v38 = vadd.f32 %v244_v33, %v243_v34 }
  0x44   : > { %v300_v49 = vadd.f32 %v299_v45, %v298_v46 }
  0x45   : > { %v246_v17 = vrot.slane %v245_v38, 4 }
  0x46   : > { %v302_v51 = vadd.f32 %v301_v48, %v300_v49 }
  0x47   : > { %v247_v44 = vadd.f32 %v246_v17, %v245_v38 }
  0x48   : > { %v303_v54 = vrot.slane %v302_v51, 4 }
  0x49   : > { %v248_v47 = vrot.slane %v247_v44, 2 }
  0x4a   : > { %v304_v56 = vadd.f32 %v303_v54, %v302_v51 }
  0x4b   : > { %v249_v50 = vadd.f32 %v248_v47, %v247_v44 }
  0x4c   : > { %v305_v58 = vrot.slane %v304_v56, 2 }
  0x4d   : > { %v250_v52 = vrot.slane %v249_v50, 1 }
  0x4e   : > { %v306_v59 = vadd.f32 %v305_v58, %v304_v56 }
  0x4f   : > { %v251_v55 = vadd.f32 %v250_v52, %v249_v50 }
  0x50   : > { %v307_v60 = vrot.slane %v306_v59, 1 }
  0x51   : > { %v252_v57 = vadd.f32 %v251_v55, %v213_v53 }
  0x52   : > { %v308_v62 = vadd.f32 %v307_v60, %v306_v59  ;;  %312 = sbr.rel (%p650_p12) target bundleno = 117 (0x75), region = 32 }
  0x53   : > { %254 = vst.msk [vmem:[#allocation3] sm:$0x1] %vm253_vm2, %v252_v57 }
  0x54   : > { %v309_v63 = vadd.f32 %v308_v62, %v255_v61 }
  0x56   : > { %310 = vst.msk [vmem:[#allocation4] sm:$0x1] %vm253_vm2, %v309_v63 }
  0x57   : > { %v320_v1 = vld [vmem:[#allocation2] sm:$0x1] }
  0x5a   : > { %v313_v0 = vld [vmem:[#allocation3] sm:$0x1] }
  0x5b   : > { %v314_v3 = vmul.f32 0.001953125, %v313_v0 }
  0x5d   : > { %v315_v2 = vld [vmem:[#allocation4] sm:$0x1]  ;;  %v317_v5 = vmul.f32 %v314_v3, %v314_v3  ;;  %v321_v6 = vadd.f32 %v320_v1, %v314_v3 }
  0x5e   : > { %v316_v4 = vmul.f32 0.001953125, %v315_v2 }
  0x5f   : > { %322 = vst.msk [vmem:[#allocation5] sm:$0x1] %vm253_vm2, %v321_v6 }
  0x60   : > { %v318_v7 = vsub.f32 %v316_v4, %v317_v5 }
  0x62   : > { %v319_v8 = vmax.f32 %v318_v7, 0.0 }
  0x64   : > { %v323_v9 = vadd.f32 1e-05, %v319_v8 }
  0x66   : > { %485 = vrsqrt.f32 %v323_v9 }
  0x73   : > { %v486_v10 = vpop.eup %485 }
  0x74   : > { %325 = vst.msk [vmem:[#allocation7] sm:$0x1] %vm253_vm2, %v486_v10 }
  0x75 PF: > { %p726_p13 = scmp.eq.s32.totalorder %s415_s14, 3  ;;  %s584_s29 = smov [#allocation5]  }
  0x76   : > { %s333_s30 = sshll.u32 %s584_s29, 4  ;;  %s585_s3 = smov [#allocation7]   ;;  %s334_s30 = int_to_ptr.vmem [resolvable:$true] %s333_s30 }
  0x77   : > { %s344_s4 = sshll.u32 %s585_s3, 4  ;;  %s487_s5 = scalar_lea.vmem %s334_s30, 16  ;;  %s345_s4 = int_to_ptr.vmem [resolvable:$true] %s344_s4 }
  0x78   : > { %p488_p0 = scmp.ne.s32.totalorder %s334_s30, %s487_s5  ;;  %s493_s6 = scalar_lea.vmem %s334_s30, 32 }
  0x79   : > { %p494_p3 = scmp.lt.s32.totalorder %s334_s30, %s334_s30  ;;  %p495_p4 = scmp.lt.s32.totalorder %s493_s6, %s487_s5 }
  0x7a   : > { %p489_p1 = pnand %p488_p0, %p726_p13 }
  0x7b   : > { %p496_p5 = por %p495_p4, %p494_p3 }
  0x7c   : > { %p490_p2 = pneg %p489_p1 }
  0x7e   : > { %p497_p6 = pnand %p496_p5, %p490_p2 }
  0x80   : > { %500 = shalt.err (!%p497_p6)
}
  0x81   : > { %431 = dma.vmem_to_hbm [thread:$0]  (%p726_p13), %s334_s30, 16, %s768_s1, [#allocation6]  }
  0x82   : > { %s511_s9 = scalar_lea.vmem %s345_s4, 16  ;;  %s517_s10 = scalar_lea.vmem %s345_s4, 32 }
  0x83   : > { %p512_p7 = scmp.ne.s32.totalorder %s345_s4, %s511_s9  ;;  %p518_p10 = scmp.lt.s32.totalorder %s345_s4, %s345_s4 }
  0x84   : > { %p519_p11 = scmp.lt.s32.totalorder %s517_s10, %s511_s9 }
  0x85   : > { %p513_p8 = pnand %p512_p7, %p726_p13 }
  0x86   : > { %p520_p12 = por %p519_p11, %p518_p10 }
  0x87   : > { %p514_p9 = pneg %p513_p8 }
  0x89   : > { %p521_p0 = pnand %p520_p12, %p514_p9 }
  0x8b   : > { %524 = shalt.err (!%p521_p0)
}
  0x8c   : > { %433 = dma.vmem_to_hbm [thread:$0]  (%p726_p13), %s345_s4, 16, %s769_s2, [#allocation8]  }
  0x8d   : > { %556 = dma.done.wait (%p726_p13), [#allocation6], 16  }
  0x8e   : > { %558 = vsyncadd (%p726_p13), [#allocation6], 4294967280 }
  0x8f   : > { %560 = dma.done.wait (%p726_p13), [#allocation8], 16  }
  0x90   : > { %562 = vsyncadd (%p726_p13), [#allocation8], 4294967280 }
  0x91 PF: > { %s15_s13 = sadd.s32 1, %s581_s13   ;;  %s773_s9 = smov %s573_s11 }
  0x92   : > { %p12_p1 = scmp.ge.s32.totalorder %s15_s13, 6   ;;  %s774_s10 = smov %s577_s12 }
  0x93   : > { %s775_s11 = smov %s778_s15  ;;  %s776_s12 = smov %s782_s16 }
  0x94   :  { %14 = sbr.rel (!%p12_p1) target bundleno = 4 (0x4), region = 67 }
  0x99   :  { %361 = vsyncpa [#allocation6], 1 }
  0x9a   :  { %363 = vsyncpa [#allocation6 + $0x1], 1 }
  0x9b   :  { %364 = vsyncpa [#allocation8], 1 }

</bundles_post_ra>
